<compile_context>
chip_gen: v7x
topology: tpu7x:2x2x1
jax: 0.10.0
libtpu: 0.0.40
codegen_flags: <defaults>
</compile_context>

<pallas_src>
import jax
import jax.numpy as jnp
from jax.experimental import pallas as pl
from jax.experimental.pallas import tpu as pltpu


def _make_ce_kernel(n_blocks, tiles_per_p):
    def kernel(logits_ref, labels_ref, out_ref):
        p = pl.program_id(0)  # parallel axis (TensorCore shard)
        i = pl.program_id(1)  # reduction ("arbitrary") axis over row tiles

        @pl.when(i == 0)
        def _init():
            out_ref[...] = jnp.zeros_like(out_ref)

        # Skip redundant clamped tail tiles entirely (their labels are all -100
        # anyway), so they cost neither VPU/EUP work nor extra HBM reads.
        @pl.when(p * tiles_per_p + i < n_blocks)
        def _compute():
            x = logits_ref[...]            # (tm, V) native dtype (f32 or bf16)
            lbl = labels_ref[...]          # (tm, 1) int32 shifted labels

            # Row max and label pick stay in the native dtype: both are exact
            # (max returns an existing value; the one-hot masked sum has a
            # single non-zero term), and for bf16 inputs this halves the
            # packed vector work of these passes.
            m = jnp.max(x, axis=-1, keepdims=True)                   # (tm, 1)
            col = jax.lax.broadcasted_iota(jnp.int32, x.shape, 1)    # (tm, V)
            picked = jnp.sum(jnp.where(col == lbl, x, 0),
                             axis=-1, keepdims=True)                 # (tm, 1)

            # Only the exp / log-sum path runs in f32 (single upcast pass).
            xm = x.astype(jnp.float32) - m.astype(jnp.float32)
            lse = m.astype(jnp.float32) + jnp.log(
                jnp.sum(jnp.exp(xm), axis=-1, keepdims=True))        # (tm, 1)

            valid = lbl != -100            # ignore_index / shift / padding rows
            # where-select (not a mask multiply) so NaN/Inf from garbage tail
            # rows past R can never leak into the accumulator.
            loss = jnp.where(valid, lse - picked.astype(jnp.float32), 0.0)

            s = jnp.sum(loss)
            c = jnp.sum(valid.astype(jnp.float32))

            # Accumulate straight into the resident lane-dense output block:
            # row 0 / lane 0 = loss sum, row 0 / lane 1 = valid count.
            row = jax.lax.broadcasted_iota(jnp.int32, out_ref.shape, 1)
            lane = jax.lax.broadcasted_iota(jnp.int32, out_ref.shape, 2)
            upd = jnp.where((row == 0) & (lane == 0), s,
                            jnp.where((row == 0) & (lane == 1), c, 0.0))
            out_ref[...] = out_ref[...] + upd

    return kernel


def _vmem_capacity_bytes():
    try:
        return int(pltpu.get_tpu_info().vmem_capacity_bytes)
    except Exception:
        return 64 * 1024 * 1024  # conservative fallback (v7x per-TC VMEM)


def _num_tensorcores():
    # v7x / v5p / v4 chips have 2 TensorCores; the "*e" (lite) parts have 1.
    # Best-effort detection; over-estimating only adds a tiny partial flush.
    try:
        kind = getattr(jax.devices()[0], "device_kind", "").lower()
        if "lite" in kind or "v5e" in kind or "v6e" in kind:
            return 1
        return 2
    except Exception:
        return 1


def gpt_lm_loss(logits, labels, *, tm=None, num_parallel=None):
    """logits: [B, S, V] float (any float dtype, streamed natively); labels: [B, S] int.
    Returns scalar mean cross-entropy over shifted (logits[:, :-1], labels[:, 1:])."""
    B, S, V = logits.shape
    R = B * S
    # leading-dim collapse only: no copy, no dtype cast, no slice, no pad of logits
    logits2d = logits.reshape(R, V)

    # shift on the (tiny) labels side: target for row (b, s) is labels[b, s+1];
    # the last position of every sequence is ignored (-100).
    neg = jnp.full((B, 1), -100, dtype=jnp.int32)
    tgt = jnp.concatenate([labels[:, 1:].astype(jnp.int32), neg], axis=1).reshape(R)

    itemsize = jnp.dtype(logits.dtype).itemsize

    # ---- generation-aware VMEM budgeting ------------------------------------
    # Per-element working set of one logits row tile:
    #   2 * itemsize : double-buffered native input tile
    #   ~12 bytes    : f32 intermediates the kernel materializes in VMEM
    #                  (xm, exp(xm), iota/compare), conservatively
    vmem_cap = _vmem_capacity_bytes()
    vmem_limit = max(32 << 20, min(int(vmem_cap * 0.85), vmem_cap - (8 << 20)))
    work_budget = max(8 << 20, vmem_limit - (6 << 20))  # labels/output/internal slack
    bytes_per_elem = 2 * itemsize + 12

    if tm is None:
        tm = work_budget // (bytes_per_elem * V)
        tm = max(8, min(2048, (tm // 8) * 8))
        tm = min(tm, ((R + 7) // 8) * 8)   # don't over-allocate for tiny inputs
    assert tm % 8 == 0, "row tile must be a multiple of 8"

    n_blocks = pl.cdiv(R, tm)                    # row tiles that touch real data
    if num_parallel is None:
        num_parallel = _num_tensorcores()
    P = max(1, min(num_parallel, n_blocks))      # megacore-parallel slices
    tiles_per_p = pl.cdiv(n_blocks, P)
    r_pad = P * tiles_per_p * tm

    # pad ONLY the labels (4 bytes/row) for the ragged tail / redundant tiles
    tgt = jnp.pad(tgt, (0, r_pad - R), constant_values=-100).reshape(r_pad, 1)

    last_block = n_blocks - 1

    def logits_map(p, i):
        # clamp redundant tail tiles onto the last real block: keeps the DMA in
        # bounds and lets Pallas elide the repeat fetch; compute is pl.when'd off.
        return (jnp.minimum(p * tiles_per_p + i, last_block), 0)

    def labels_map(p, i):
        return (p * tiles_per_p + i, 0)

    def out_map(p, i):
        return (p, 0, 0)

    partials = pl.pallas_call(
        _make_ce_kernel(n_blocks, tiles_per_p),
        out_shape=jax.ShapeDtypeStruct((P, 8, 128), jnp.float32),
        grid_spec=pltpu.PrefetchScalarGridSpec(
            num_scalar_prefetch=0,
            grid=(P, tiles_per_p),
            in_specs=[
                pl.BlockSpec((tm, V), logits_map),   # logits tile (native dtype)
                pl.BlockSpec((tm, 1), labels_map),   # shifted-label tile
            ],
            out_specs=pl.BlockSpec((1, 8, 128), out_map),
        ),
        compiler_params=pltpu.CompilerParams(
            dimension_semantics=("parallel", "arbitrary"),
            vmem_limit_bytes=int(vmem_limit),
        ),
    )(logits2d, tgt)

    total = jnp.sum(partials[:, 0, 0])
    count = jnp.sum(partials[:, 0, 1])
    return total / count


def _reference(logits, labels):
    """Pure-JAX reference with the same (torch CrossEntropyLoss) semantics."""
    B, S, V = logits.shape
    sl = logits[:, :-1, :].reshape(-1, V).astype(jnp.float32)
    tl = labels[:, 1:].reshape(-1).astype(jnp.int32)
    lse = jax.nn.logsumexp(sl, axis=-1)
    picked = jnp.take_along_axis(sl, jnp.maximum(tl, 0)[:, None], axis=-1)[:, 0]
    valid = tl != -100
    loss = jnp.where(valid, lse - picked, 0.0)
    return jnp.sum(loss) / jnp.sum(valid.astype(jnp.float32))


if __name__ == "__main__":
    key = jax.random.PRNGKey(0)
    k1, k2, k3, k4 = jax.random.split(key, 4)

    # Test 1: small GPT-like shapes (batch=2, seq=9, vocab=128), f32, auto tile.
    B, S, V = 2, 9, 128
    logits = jax.random.normal(k1, (B, S, V), dtype=jnp.float32)
    labels = jax.random.randint(k2, (B, S), 0, V, dtype=jnp.int32)
    loss = gpt_lm_loss(logits, labels)
    jax.block_until_ready(loss)
    ref = _reference(logits, labels)
    assert jnp.allclose(loss, ref, rtol=1e-5, atol=1e-5), (loss, ref)

    # Test 2: multi-tile grid with a ragged last row block (260 rows, tm=64),
    # exercising the clamped-tail pl.when guard and explicit num_parallel=2.
    B2, S2 = 4, 65
    logits2 = jax.random.normal(k3, (B2, S2, V), dtype=jnp.float32)
    labels2 = jax.random.randint(k4, (B2, S2), 0, V, dtype=jnp.int32)
    loss2 = gpt_lm_loss(logits2, labels2, tm=64, num_parallel=2)
    jax.block_until_ready(loss2)
    ref2 = _reference(logits2, labels2)
    assert jnp.allclose(loss2, ref2, rtol=1e-5, atol=1e-5), (loss2, ref2)

    # Test 3: native bf16 logits (no wrapper upcast; exp path upcast in VMEM,
    # max / label-pick stay in bf16 and are exact).
    loss3 = gpt_lm_loss(logits.astype(jnp.bfloat16), labels)
    jax.block_until_ready(loss3)
    ref3 = _reference(logits.astype(jnp.bfloat16).astype(jnp.float32), labels)
    assert jnp.allclose(loss3, ref3, rtol=1e-3, atol=1e-3), (loss3, ref3)

    print("KERNEL_OK")
</pallas_src>

<mosaic_0001>
module attributes {stable_mosaic.version = 11 : i64} {
  func.func @kernel(%arg0: i32, %arg1: i32, %arg2: memref<24x128xf32, #tpu.memory_space<vmem>>, %arg3: memref<24x1xi32, #tpu.memory_space<vmem>>, %arg4: memref<1x8x128xf32, #tpu.memory_space<vmem>>) attributes {dimension_semantics = [#tpu.dimension_semantics<parallel>, #tpu.dimension_semantics<arbitrary>], iteration_bounds = array<i64: 1, 1>, scalar_prefetch = 0 : i64, scratch_operands = 0 : i64, tpu.core_type = #tpu.core_type<tc>, window_params = [{transform_indices = @transform_0, window_bounds = array<i64: 24, 128>}, {transform_indices = @transform_1, window_bounds = array<i64: 24, 1>}, {transform_indices = @transform_2, window_bounds = array<i64: 1, 8, 128>}]} {
    %c0_i32 = arith.constant 0 : i32
    %0 = arith.cmpi eq, %arg1, %c0_i32 : i32
    %1 = arith.extui %0 : i1 to i32
    %c0_i32_0 = arith.constant 0 : i32
    %2 = arith.cmpi ne, %1, %c0_i32_0 : i32
    scf.if %2 {
      %cst = arith.constant 0.000000e+00 : f32
      %8 = vector.broadcast %cst : f32 to vector<1x8x128xf32>
      %c0 = arith.constant 0 : index
      %c0_3 = arith.constant 0 : index
      %c0_4 = arith.constant 0 : index
      %9 = vector.load %arg4[%c0, %c0_3, %c0_4] : memref<1x8x128xf32, #tpu.memory_space<vmem>>, vector<1x8x128xf32>
      tpu.vector_store %arg4[%c0, %c0_3, %c0_4], %8 {strides = array<i32>} : memref<1x8x128xf32, #tpu.memory_space<vmem>>, vector<1x8x128xf32>,
    } else {
    }
    %c1_i32 = arith.constant 1 : i32
    %3 = arith.muli %arg0, %c1_i32 : i32
    %4 = arith.addi %3, %arg1 : i32
    %c1_i32_1 = arith.constant 1 : i32
    %5 = arith.cmpi slt, %4, %c1_i32_1 : i32
    %6 = arith.extui %5 : i1 to i32
    %c0_i32_2 = arith.constant 0 : i32
    %7 = arith.cmpi ne, %6, %c0_i32_2 : i32
    scf.if %7 {
      %c0 = arith.constant 0 : index
      %c0_3 = arith.constant 0 : index
      %8 = vector.load %arg2[%c0, %c0_3] : memref<24x128xf32, #tpu.memory_space<vmem>>, vector<24x128xf32>
      %c0_4 = arith.constant 0 : index
      %c0_5 = arith.constant 0 : index
      %9 = vector.load %arg3[%c0_4, %c0_5] : memref<24x1xi32, #tpu.memory_space<vmem>>, vector<24x1xi32>
      %cst = arith.constant dense<0xFF800000> : vector<24xf32>
      %10 = vector.multi_reduction <maximumf>, %8, %cst [1] : vector<24x128xf32> to vector<24xf32>
      %11 = vector.shape_cast %10 : vector<24xf32> to vector<24x1xf32>
      %12 = tpu.iota {dimensions = array<i32: 1>} : vector<24x128xi32>
      %13 = vector.broadcast %9 : vector<24x1xi32> to vector<24x128xi32>
      %14 = arith.cmpi eq, %12, %13 : vector<24x128xi32>
      %c0_i32_6 = arith.constant 0 : i32
      %15 = arith.sitofp %c0_i32_6 : i32 to f32
      %16 = vector.broadcast %15 : f32 to vector<24x128xf32>
      %17 = arith.select %14, %8, %16 : vector<24x128xi1>, vector<24x128xf32>
      %cst_7 = arith.constant dense<0.000000e+00> : vector<24xf32>
      %18 = vector.multi_reduction <add>, %17, %cst_7 [1] : vector<24x128xf32> to vector<24xf32>
      %19 = vector.shape_cast %18 : vector<24xf32> to vector<24x1xf32>
      %20 = vector.broadcast %11 : vector<24x1xf32> to vector<24x128xf32>
      %21 = arith.subf %8, %20 : vector<24x128xf32>
      %22 = math.exp %21 : vector<24x128xf32>
      %cst_8 = arith.constant dense<0.000000e+00> : vector<24xf32>
      %23 = vector.multi_reduction <add>, %22, %cst_8 [1] : vector<24x128xf32> to vector<24xf32>
      %24 = vector.shape_cast %23 : vector<24xf32> to vector<24x1xf32>
      %25 = math.log %24 : vector<24x1xf32>
      %26 = arith.addf %11, %25 : vector<24x1xf32>
      %c-100_i32 = arith.constant -100 : i32
      %27 = vector.broadcast %c-100_i32 : i32 to vector<24x1xi32>
      %28 = arith.cmpi ne, %9, %27 : vector<24x1xi32>
      %29 = arith.subf %26, %19 : vector<24x1xf32>
      %cst_9 = arith.constant 0.000000e+00 : f32
      %30 = vector.broadcast %cst_9 : f32 to vector<24x1xf32>
      %31 = arith.select %28, %29, %30 : vector<24x1xi1>, vector<24x1xf32>
      %32 = vector.shape_cast %31 : vector<24x1xf32> to vector<1x24x1xf32>
      %cst_10 = arith.constant dense<0.000000e+00> : vector<1xf32>
      %33 = vector.multi_reduction <add>, %32, %cst_10 [1, 2] : vector<1x24x1xf32> to vector<1xf32>
      %34 = vector.shape_cast %33 : vector<1xf32> to vector<1x1x1xf32>
      %35 = vector.extract %34[0, 0, 0] : f32 from vector<1x1x1xf32>
      %36 = arith.extui %28 : vector<24x1xi1> to vector<24x1xi32>
      %37 = arith.sitofp %36 : vector<24x1xi32> to vector<24x1xf32>
      %38 = vector.shape_cast %37 : vector<24x1xf32> to vector<1x24x1xf32>
      %cst_11 = arith.constant dense<0.000000e+00> : vector<1xf32>
      %39 = vector.multi_reduction <add>, %38, %cst_11 [1, 2] : vector<1x24x1xf32> to vector<1xf32>
      %40 = vector.shape_cast %39 : vector<1xf32> to vector<1x1x1xf32>
      %41 = vector.extract %40[0, 0, 0] : f32 from vector<1x1x1xf32>
      %42 = tpu.iota {dimensions = array<i32: 1>} : vector<1x8x128xi32>
      %43 = tpu.iota {dimensions = array<i32: 2>} : vector<1x8x128xi32>
      %c0_i32_12 = arith.constant 0 : i32
      %44 = vector.broadcast %c0_i32_12 : i32 to vector<1x8x128xi32>
      %45 = arith.cmpi eq, %42, %44 : vector<1x8x128xi32>
      %c0_i32_13 = arith.constant 0 : i32
      %46 = vector.broadcast %c0_i32_13 : i32 to vector<1x8x128xi32>
      %47 = arith.cmpi eq, %43, %46 : vector<1x8x128xi32>
      %48 = arith.andi %45, %47 : vector<1x8x128xi1>
      %c0_i32_14 = arith.constant 0 : i32
      %49 = vector.broadcast %c0_i32_14 : i32 to vector<1x8x128xi32>
      %50 = arith.cmpi eq, %42, %49 : vector<1x8x128xi32>
      %c1_i32_15 = arith.constant 1 : i32
      %51 = vector.broadcast %c1_i32_15 : i32 to vector<1x8x128xi32>
      %52 = arith.cmpi eq, %43, %51 : vector<1x8x128xi32>
      %53 = arith.andi %50, %52 : vector<1x8x128xi1>
      %cst_16 = arith.constant 0.000000e+00 : f32
      %54 = vector.broadcast %41 : f32 to vector<1x8x128xf32>
      %55 = vector.broadcast %cst_16 : f32 to vector<1x8x128xf32>
      %56 = arith.select %53, %54, %55 : vector<1x8x128xi1>, vector<1x8x128xf32>
      %57 = vector.broadcast %35 : f32 to vector<1x8x128xf32>
      %58 = arith.select %48, %57, %56 : vector<1x8x128xi1>, vector<1x8x128xf32>
      %c0_17 = arith.constant 0 : index
      %c0_18 = arith.constant 0 : index
      %c0_19 = arith.constant 0 : index
      %59 = vector.load %arg4[%c0_17, %c0_18, %c0_19] : memref<1x8x128xf32, #tpu.memory_space<vmem>>, vector<1x8x128xf32>
      %60 = arith.addf %59, %58 : vector<1x8x128xf32>
      %c0_20 = arith.constant 0 : index
      %c0_21 = arith.constant 0 : index
      %c0_22 = arith.constant 0 : index
      %61 = vector.load %arg4[%c0_20, %c0_21, %c0_22] : memref<1x8x128xf32, #tpu.memory_space<vmem>>, vector<1x8x128xf32>
      tpu.vector_store %arg4[%c0_20, %c0_21, %c0_22], %60 {strides = array<i32>} : memref<1x8x128xf32, #tpu.memory_space<vmem>>, vector<1x8x128xf32>,
    } else {
    }
    return
  }
  func.func @transform_0(%arg0: i32, %arg1: i32) -> (i32, i32) {
    %c1_i32 = arith.constant 1 : i32
    %0 = arith.muli %arg0, %c1_i32 : i32
    %1 = arith.addi %0, %arg1 : i32
    %c0_i32 = arith.constant 0 : i32
    %2 = arith.minsi %1, %c0_i32 : i32
    %c0_i32_0 = arith.constant 0 : i32
    %c0_i32_1 = arith.constant 0 : i32
    return %2, %c0_i32_0 : i32, i32
  }
  func.func @transform_1(%arg0: i32, %arg1: i32) -> (i32, i32) {
    %c1_i32 = arith.constant 1 : i32
    %0 = arith.muli %arg0, %c1_i32 : i32
    %1 = arith.addi %0, %arg1 : i32
    %c0_i32 = arith.constant 0 : i32
    %c0_i32_0 = arith.constant 0 : i32
    return %1, %c0_i32 : i32, i32
  }
  func.func @transform_2(%arg0: i32, %arg1: i32) -> (i32, i32, i32) {
    %c0_i32 = arith.constant 0 : i32
    %c0_i32_0 = arith.constant 0 : i32
    %c0_i32_1 = arith.constant 0 : i32
    return %arg0, %c0_i32, %c0_i32_0 : i32, i32, i32
  }
}

</mosaic_0001>

<bundles_post_ra>
// kernel: tpu_custom_call.1
= control target key start
LH: loop header
LB: loop body
LE: loop exit
PB: predicated region body
PF: predicated region fallthrough
CT: control target
= control target key end

     0   :  { %v267_v3 = vmov 0   ;;  %s354_s0 = inlined_call_operand.vmem [shape: f32[18,128], index: 0, kind: input, shape index: {}]   ;;  %s355_s1 = inlined_call_operand.vmem [shape: s32[24,1], index: 1, kind: input, shape index: {}]   ;;  %s356_s2 = inlined_call_operand.hbm [shape: f32[1,8,128], index: 2, kind: output, shape index: {}]  }
   0x1   :  { %v76_v0 = vld [vmem:[%s354_s0] sm:$0xff]  ;;  %v78_v1 = vld [vmem:[%s354_s0 + $0x10] sm:$0xff]  ;;  %v77_v2 = vld [vmem:[%s354_s0 + $0x8] sm:$0xff]  ;;  %229 = vset.pattern.permute.xlu1 %v267_v3  ;;  %230 = vset.pattern.permute.xlu0 %v267_v3 }
   0x2   :  { %82 = vmax.xlane.f32.xlu0 %v76_v0  ;;  %86 = vmax.xlane.f32.xlu1 %v78_v1 }
   0x3   :  { %7 = vsyncpa [#allocation3], 0  ;;  %v297_v4 = vld [vmem:[%s355_s1] sm:$0xff]  ;;  %v303_v5 = vld [vmem:[%s355_s1 + $0x10] sm:$0xff]  ;;  %v88_v16 = vlaneseq  ;;  %v268_v27 = vmov 0.0   ;;  %vm144_vm5 = vcmask 7168  }
   0x4   :  { %v309_v6 = vld [vmem:[%s355_s1 + $0x8] sm:$0xff]  ;;  %vm135_vm3 = vcmp.ne.s32.totalorder %v297_v4, 4294967196  ;;  %vm137_vm6 = vcmp.ne.s32.totalorder %v303_v5, 4294967196  ;;  %s269_s21 = smov [#allocation2]  }
   0x5   :  { %v313_v17 = vand.u32 127, %v88_v16  ;;  %vm136_vm4 = vcmp.ne.s32.totalorder %v309_v6, 4294967196  ;;  %v219_v28 = vsel %vm135_vm3, 1.0, %v268_v27  ;;  %v221_v32 = vsel %vm137_vm6, 1.0, %v268_v27  ;;  %s199_s22 = sshll.u32 %s269_s21, 4  ;;  %s200_s22 = int_to_ptr.vmem [resolvable:$true] %s199_s22 }
   0x6   :  { %84 = vmax.xlane.f32.xlu0 %v77_v2  ;;  %v220_v29 = vsel %vm136_vm4, 1.0, %v268_v27  ;;  %v165_v30 = vsel %vm144_vm5, %v219_v28, 0.0  ;;  %v168_v34 = vsel %vm144_vm5, %v221_v32, 0.0  ;;  %s243_s23 = scalar_lea.vmem %s200_s22, 128  ;;  %p248_p1 = scmp.lt.s32.totalorder %s200_s22, %s200_s22 }
   0x7   :  { %v166_v31 = vsel %vm144_vm5, %v220_v29, 0.0  ;;  %vm184_vm8 = vcmp.eq.s32.totalorder %v313_v17, 1  ;;  %vm182_vm9 = vcmp.eq.s32.totalorder %v313_v17, 0  ;;  %p244_p0 = scmp.ne.s32.totalorder %s200_s22, %s243_s23  ;;  %p249_p2 = scmp.lt.s32.totalorder %s243_s23, %s243_s23 }
   0x8   :  { %v167_v33 = vadd.f32 %v166_v31, %v165_v30 }
   0x9   :  { %p250_p3 = por %p249_p2, %p248_p1 }
   0xa   :  { %v169_v35 = vadd.f32 %v168_v34, %v167_v33 }
   0xb   :  { %p251_p4 = pnand %p250_p3, %p244_p0 }
  0x13   :  { %91 = vperm.xlu1 %229, %v297_v4  }
  0x17   :  { %97 = vperm.xlu1 %229, %v303_v5  }
  0x1c   :  { %94 = vperm.xlu0 %230, %v309_v6  }
  0x8f   :  { %v83_v7 = vpop.xlane.xlu0 %82  ;;  %v87_v8 = vpop.xlane.xlu1 %86 }
  0x90   :  { %v111_v9 = vsub.f32 %v76_v0, %v83_v7  ;;  %v113_v10 = vsub.f32 %v78_v1, %v87_v8 }
  0x92   :  { %v114_v11 = vmul.f32 1.442695, %v111_v9  ;;  %v118_v12 = vmul.f32 1.442695, %v113_v10 }
  0x93   :  { %v85_v13 = vpop.xlane.xlu0 %84  ;;  %v92_v19 = vpop.permute.xlu1 %91 }
  0x94   :  { %231 = vpow2.f32 %v114_v11  ;;  %v112_v14 = vsub.f32 %v77_v2, %v85_v13  ;;  %vm99_vm0 = vcmp.eq.s32.totalorder %v313_v17, %v92_v19 }
  0x95   :  { %233 = vpow2.f32 %v118_v12  ;;  %v102_v23 = vsel %vm99_vm0, %v76_v0, 0.0  ;;  %v180_v12 = vshrl.u32 %v88_v16, 7 }
  0x96   :  { %v116_v15 = vmul.f32 1.442695, %v112_v14 }
  0x97   :  { %v98_v24 = vpop.permute.xlu1 %97  ;;  %vm181_vm7 = vcmp.eq.s32.totalorder %v180_v12, 0 }
  0x98   :  { %235 = vpow2.f32 %v116_v15  ;;  %vm101_vm2 = vcmp.eq.s32.totalorder %v313_v17, %v98_v24  ;;  %vm185_vm10 = vmand %vm181_vm7, %vm184_vm8 }
  0x99   :  { %v104_v26 = vsel %vm101_vm2, %v78_v1, 0.0  ;;  %vm183_vm11 = vmand %vm181_vm7, %vm182_vm9 }
  0x9b   :  { %v95_v22 = vpop.permute.xlu0 %94 }
  0x9c   :  { %vm100_vm1 = vcmp.eq.s32.totalorder %v313_v17, %v95_v22 }
  0x9d   :  { %v103_v25 = vsel %vm100_vm1, %v77_v2, 0.0 }
  0x9e   :  { %v232_v18 = vpop.eup %231 }
  0x9f   :  { %120 = vadd.xlane.f32.xlu1 %v232_v18  ;;  %v234_v20 = vpop.eup %233 }
  0xa2   :  { %v236_v21 = vpop.eup %235 }
  0xa3   :  { %124 = vadd.xlane.f32.xlu1 %v234_v20  ;;  %122 = vadd.xlane.f32.xlu0 %v236_v21 }
  0xa7   :  { %105 = vadd.xlane.f32.xlu1 %v102_v23 }
  0xab   :  { %107 = vadd.xlane.f32.xlu1 %v103_v25 }
  0xaf   :  { %109 = vadd.xlane.f32.xlu1 %v104_v26 }
 0x12c   :  { %v121_v36 = vpop.xlane.xlu1 %120 }
 0x12d   :  { %237 = vlog2.f32 %v121_v36 }
 0x130   :  { %v125_v37 = vpop.xlane.xlu1 %124  ;;  %v123_v38 = vpop.xlane.xlu0 %122 }
 0x131   :  { %239 = vlog2.f32 %v125_v37 }
 0x132   :  { %241 = vlog2.f32 %v123_v38 }
 0x134   :  { %v106_v39 = vpop.xlane.xlu1 %105 }
 0x137   :  { %v238_v40 = vpop.eup %237 }
 0x138   :  { %v127_v41 = vmul.f32 0.6931472, %v238_v40  ;;  %v108_v42 = vpop.xlane.xlu1 %107 }
 0x13a   :  { %v132_v43 = vadd.f32 %v127_v41, %v83_v7 }
 0x13b   :  { %v240_v44 = vpop.eup %239 }
 0x13c   :  { %v242_v45 = vpop.eup %241  ;;  %v131_v46 = vmul.f32 0.6931472, %v240_v44  ;;  %v138_v48 = vsub.f32 %v132_v43, %v106_v39  ;;  %v110_v51 = vpop.xlane.xlu1 %109 }
 0x13d   :  { %v129_v47 = vmul.f32 0.6931472, %v242_v45 }
 0x13e   :  { %v134_v49 = vadd.f32 %v131_v46, %v87_v8  ;;  %v141_v53 = vsel %vm135_vm3, %v138_v48, 0.0 }
 0x13f   :  { %v133_v50 = vadd.f32 %v129_v47, %v85_v13  ;;  %v145_v57 = vsel %vm144_vm5, %v141_v53, 0.0 }
 0x140   :  { %v140_v52 = vsub.f32 %v134_v49, %v110_v51 }
 0x141   :  { %v139_v54 = vsub.f32 %v133_v50, %v108_v42 }
 0x142   :  { %v143_v56 = vsel %vm137_vm6, %v140_v52, 0.0 }
 0x143   :  { %v142_v55 = vsel %vm136_vm4, %v139_v54, 0.0  ;;  %v148_v60 = vsel %vm144_vm5, %v143_v56, 0.0 }
 0x144   :  { %v146_v58 = vsel %vm144_vm5, %v142_v55, 0.0 }
 0x145   :  { %v147_v59 = vadd.f32 %v146_v58, %v145_v57 }
 0x147   :  { %v149_v61 = vadd.f32 %v148_v60, %v147_v59 }
 0x149   :  { %150 = vadd.xlane.f32.xlu1 %v149_v61 }
 0x14d   :  { %170 = vadd.xlane.f32.xlu1 %v169_v35 }
 0x1d6   :  { %v151_v62 = vpop.xlane.xlu1 %150 }
 0x1d7   :  { %v152_v63 = vrot.slane %v151_v62, 4 }
 0x1d9   :  { %v153_v0 = vadd.f32 %v152_v63, %v151_v62 }
 0x1da   :  { %v171_v1 = vpop.xlane.xlu1 %170 }
 0x1db   :  { %v154_v2 = vrot.slane %v153_v0, 2  ;;  %v172_v3 = vrot.slane %v171_v1, 4 }
 0x1dd   :  { %v173_v4 = vadd.f32 %v172_v3, %v171_v1  ;;  %v155_v6 = vadd.f32 %v154_v2, %v153_v0 }
 0x1df   :  { %v174_v5 = vrot.slane %v173_v4, 2  ;;  %v156_v7 = vrot.slane %v155_v6, 1 }
 0x1e1   :  { %v175_v8 = vadd.f32 %v174_v5, %v173_v4  ;;  %v157_v9 = vadd.f32 %v156_v7, %v155_v6 }
 0x1e3   :  { %222 = vpush %v157_v9  ;;  %v176_v10 = vrot.slane %v175_v8, 1 }
 0x1e5   :  { %v177_v11 = vadd.f32 %v176_v10, %v175_v8 }
 0x1e7   :  { %224 = vpush %v177_v11 }
 0x214   :  { %s223_s1 = spop %222 }
 0x215   :  { %v188_v14 = vstv %s223_s1 }
 0x218   :  { %s225_s20 = spop %224 }
 0x219   :  { %v186_v13 = vstv %s225_s20 }
 0x21a   :  { %v187_v15 = vsel %vm185_vm10, %v186_v13, 0.0 }
 0x21b   :  { %v189_v18 = vsel %vm183_vm11, %v188_v14, %v187_v15 }
 0x21c   :  { %192 = vst [vmem:[#allocation2] sm:$0xff] %v189_v18 }
 0x21d   :  { %254 = shalt.err (!%p251_p4)
}
 0x21e   :  { %s255_s26 = scalar_lea.hbm %s356_s2, 128 }
 0x21f   :  { %p256_p5 = scmp.ne.s32.totalorder %s356_s2, %s255_s26  ;;  %p259_p6 = scmp.lt.u32.totalorder %s255_s26, %s356_s2 }
 0x221   :  { %p261_p7 = pnand %p259_p6, %p256_p5 }
 0x223   :  { %264 = shalt.err (!%p261_p7)
}
 0x224   :  { %202 = dma.vmem_to_hbm [thread:$0]  %s200_s22, 128, %s356_s2, [#allocation3]  }
 0x225   :  { %265 = dma.done.wait [#allocation3], 128  }
 0x226   :  { %266 = vsyncadd [#allocation3], 4294967168 }
 0x227   :  { %206 = vsyncpa [#allocation3], 1 }

</bundles_post_ra>
